<compile_context>
chip_gen: v7x
topology: tpu7x:2x2x1
jax: 0.10.0
libtpu: 0.0.40
codegen_flags: <defaults>
</compile_context>

<pallas_src>
import jax
import jax.numpy as jnp
from jax.experimental import pallas as pl
from jax.experimental.pallas import tpu as pltpu


# ----------------------------- Pallas kernel -------------------------------

def _fused_gcn_kernel(a_ref, xw0_hbm, w_ref, b_ref, o_ref, xw_buf):
    """Grid = (num_layers, num_row_blocks); both axes are sequential.

    a_ref   : [tm, Np]    bf16  row block of A_hat (whole A if tm == Np)
    xw0_hbm : [Np, Fp]    bf16  HBM ref: x @ W0, precomputed & padded outside
    w_ref   : [Fp, Fp]    bf16  NEXT layer's weight W[l+1] (zeros at last layer)
    b_ref   : [1,  Fp]    f32   current layer's bias b[l]
    o_ref   : [tm, Cp]    f32   output row block (written only at last layer)
    xw_buf  : [2, Np, Fp] bf16  ping-pong scratch holding h_{l-1} @ W[l]
    """
    l = pl.program_id(0)
    i = pl.program_id(1)
    n_layers = pl.num_programs(0)
    tm, cp = a_ref.shape[0], o_ref.shape[1]
    cur = l % 2                               # slot holding this layer's h @ W

    # One-time prologue: DMA the precomputed x @ W0 straight into slot 0 of
    # the ping-pong scratch (x / xw0 never occupies pipelined VMEM).
    @pl.when((l == 0) & (i == 0))
    def _():
        pltpu.sync_copy(xw0_hbm, xw_buf.at[0])

    # Neighborhood aggregation for this row block: A_hat[i] @ (h @ W[l]) + b[l]
    # (MXU, f32 accumulation).
    h = jnp.dot(a_ref[...], xw_buf[cur], preferred_element_type=jnp.float32)
    h = h + b_ref[...]

    row0 = pl.multiple_of(i * tm, 128)

    @pl.when(l != n_layers - 1)
    def _():
        # Hidden layer: ReLU, then immediately produce this row block's slice
        # of the NEXT layer's feature transform (no serialized per-layer
        # prologue matmul, no h_buf scratch or writeback).
        hr = jnp.maximum(h, 0.0).astype(xw_buf.dtype)
        xw_n = jnp.dot(hr, w_ref[...],
                       preferred_element_type=jnp.float32).astype(xw_buf.dtype)

        @pl.when(cur == 0)
        def _():
            xw_buf[1, pl.ds(row0, tm), :] = xw_n

        @pl.when(cur == 1)
        def _():
            xw_buf[0, pl.ds(row0, tm), :] = xw_n

    @pl.when(l == n_layers - 1)
    def _():
        # Final classifier layer: no activation; single lane-dense store.
        o_ref[...] = h[:, :cp].astype(o_ref.dtype)


# ------------------------------ wrapper -------------------------------------

def _round_up(x, m):
    return ((x + m - 1) // m) * m


def _pad2(x, rows, cols):
    r, c = x.shape
    return jnp.pad(x, ((0, rows - r), (0, cols - c)))


def _vmem_capacity_bytes():
    try:
        return int(pltpu.get_tpu_info().vmem_capacity_bytes)
    except Exception:
        return 64 * 1024 * 1024          # v7x per-TC capacity (the smallest)


def _fixed_vmem_bytes(np_, fp):
    xw = 2 * np_ * fp * 2                # ping-pong scratch (bf16)
    w = 2 * fp * fp * 2                  # double-buffered W block
    b = 2 * 8 * fp * 4                   # bias block (sublane-padded)
    return xw + w + b


def _plan_tiles(n, fp, cp):
    """Pick (padded node count, A row tile) so the FULL working set fits VMEM."""
    cap = _vmem_capacity_bytes()
    budget = int(cap * 0.7)              # ~45 MiB on v7x, ~90 MiB on v5e/v6e

    # Preferred: whole A_hat resident in VMEM -> A is read from HBM once for
    # ALL layers (the dominant HBM-traffic saving; this path is memory-bound).
    np_res = _round_up(n, 128)
    a_res = 2 * np_res * np_res * 2      # Pallas double-buffers the block
    if a_res + _fixed_vmem_bytes(np_res, fp) + 2 * np_res * cp * 4 <= budget:
        return np_res, np_res

    # Otherwise stream A row blocks; prefer big 256-aligned tiles (v6e/v7x MXU
    # is 256 wide) and pad N so the chosen tile divides it evenly.
    for tm in (1024, 512, 256, 128):
        np_ = _round_up(n, max(tm, 128))
        a_cost = 2 * tm * np_ * 2
        if a_cost + _fixed_vmem_bytes(np_, fp) + 2 * tm * cp * 4 <= budget:
            return np_, tm
    return _round_up(n, 128), 128


def _fused_gcn_call(a_p, xw0_p, w_p, b_p, np_, fp, cp, n_layers_total, tm,
                    vmem_limit):
    flops = (n_layers_total * 2 * np_ * np_ * fp
             + (n_layers_total - 1) * 2 * np_ * fp * fp)
    a_passes = 1 if tm == np_ else n_layers_total
    bytes_accessed = (a_passes * np_ * np_ * 2 + np_ * fp * 2
                      + n_layers_total * fp * fp * 2
                      + n_layers_total * fp * 4 + np_ * cp * 4)
    return pl.pallas_call(
        _fused_gcn_kernel,
        out_shape=jax.ShapeDtypeStruct((np_, cp), jnp.float32),
        grid_spec=pltpu.PrefetchScalarGridSpec(
            num_scalar_prefetch=0,
            grid=(n_layers_total, np_ // tm),
            in_specs=[
                pl.BlockSpec((tm, np_), lambda l, i: (i, 0)),          # A rows
                pl.BlockSpec(memory_space=pl.ANY),                     # x @ W0
                pl.BlockSpec((None, fp, fp), lambda l, i: (l, 0, 0)),  # W[l+1]
                pl.BlockSpec((None, 1, fp), lambda l, i: (l, 0, 0)),   # b[l]
            ],
            out_specs=pl.BlockSpec((tm, cp), lambda l, i: (i, 0)),
            scratch_shapes=[
                pltpu.VMEM((2, np_, fp), jnp.bfloat16),   # xw ping-pong
            ]),
        compiler_params=pltpu.CompilerParams(
            # Both axes MUST stay "arbitrary": the ping-pong scratch carries
            # state across row blocks and layers.
            dimension_semantics=("arbitrary", "arbitrary"),
            vmem_limit_bytes=vmem_limit),
        cost_estimate=pl.CostEstimate(
            flops=flops, transcendentals=0, bytes_accessed=bytes_accessed),
    )(a_p, xw0_p, w_p, b_p)


def gcn_forward(a_hat, features, params, n_layers=None, dropout_p=0.5):
    """Matches GCN.forward in eval mode (dropout layers are identity)."""
    del n_layers, dropout_p
    n = features.shape[0]
    n_classes = params[-1][0].shape[1]
    out_dims = [w.shape[1] for (w, _) in params]
    num_layers_total = len(params)

    # In-kernel feature width: only hidden/class dims. The input feature dim
    # never inflates kernel padding -- layer 0's x @ W0 is computed here at its
    # natural K and only its (N, hidden) result enters the kernel.
    fp = _round_up(max(out_dims), 128)
    cp = _round_up(n_classes, 128)
    np_, tm = _plan_tiles(n, fp, cp)

    w0 = params[0][0].astype(jnp.bfloat16)
    xw0 = jnp.dot(features.astype(jnp.bfloat16), w0,
                  preferred_element_type=jnp.float32).astype(jnp.bfloat16)
    xw0_p = _pad2(xw0, np_, fp)

    a_p = _pad2(a_hat, np_, np_).astype(jnp.bfloat16)

    # Stack the NEXT-layer weights W[1..L-1] (all K = n_hidden), plus one dummy
    # zero layer so the last grid layer's weight prefetch stays in bounds.
    w_next = [_pad2(w.astype(jnp.bfloat16), fp, fp) for (w, _) in params[1:]]
    w_next.append(jnp.zeros((fp, fp), jnp.bfloat16))
    w_p = jnp.stack(w_next)                                    # [L, fp, fp]
    b_p = jnp.stack([_pad2(b.astype(jnp.float32), 1, fp) for (_, b) in params])

    ws = (2 * tm * np_ * 2 + _fixed_vmem_bytes(np_, fp) + 2 * tm * cp * 4)
    vmem_limit = int(min(_vmem_capacity_bytes() * 0.9, ws + (16 << 20)))

    out = _fused_gcn_call(a_p, xw0_p, w_p, b_p, np_, fp, cp,
                          num_layers_total, tm, vmem_limit)
    return out[:n, :n_classes]


# ------------------------------ GCN params ----------------------------------

def init_gcn_params(key, in_feats, n_hidden, n_classes, n_layers):
    """Deterministic glorot-style init; layout mirrors the PyTorch module."""
    dims = [(in_feats, n_hidden)]
    for _ in range(n_layers - 1):
        dims.append((n_hidden, n_hidden))
    dims.append((n_hidden, n_classes))

    params = []
    for (fi, fo) in dims:
        key, wk = jax.random.split(key)
        scale = jnp.sqrt(6.0 / (fi + fo))
        w = jax.random.uniform(wk, (fi, fo), jnp.float32, -scale, scale)
        b = jnp.zeros((1, fo), jnp.float32)
        params.append((w, b))
    return params


def build_normalized_adjacency(key, n_nodes, edge_prob=0.3):
    """Random symmetric graph with self-loops, symmetric normalization."""
    a = (jax.random.uniform(key, (n_nodes, n_nodes)) < edge_prob).astype(jnp.float32)
    a = jnp.maximum(a, a.T)                       # undirected
    a = a + jnp.eye(n_nodes, dtype=jnp.float32)   # self-loops
    a = jnp.minimum(a, 1.0)
    deg = jnp.sum(a, axis=1)
    d_inv_sqrt = 1.0 / jnp.sqrt(deg)
    return a * d_inv_sqrt[:, None] * d_inv_sqrt[None, :]


# -------------------------------- main ---------------------------------------

if __name__ == "__main__":
    key = jax.random.PRNGKey(0)
    k_graph, k_feat, k_param = jax.random.split(key, 3)

    n_nodes = 64
    in_feats = 16
    n_hidden = 32
    n_classes = 8
    n_layers = 2  # -> 3 GraphConv layers total, as in the module

    a_hat = build_normalized_adjacency(k_graph, n_nodes)
    features = jax.random.normal(k_feat, (n_nodes, in_feats), jnp.float32)
    params = init_gcn_params(k_param, in_feats, n_hidden, n_classes, n_layers)

    out = gcn_forward(a_hat, features, params, n_layers)
    out = jax.block_until_ready(out)

    # Reference mirroring the kernel numerics (bf16 operands, f32 accumulation).
    L = len(params)
    a_bf = a_hat.astype(jnp.bfloat16)
    xw = jnp.dot(features.astype(jnp.bfloat16), params[0][0].astype(jnp.bfloat16),
                 preferred_element_type=jnp.float32).astype(jnp.bfloat16)
    ref = None
    for idx in range(L):
        ref = jnp.dot(a_bf, xw, preferred_element_type=jnp.float32) + params[idx][1]
        if idx != L - 1:
            hr = jnp.maximum(ref, 0.0).astype(jnp.bfloat16)
            xw = jnp.dot(hr, params[idx + 1][0].astype(jnp.bfloat16),
                         preferred_element_type=jnp.float32).astype(jnp.bfloat16)

    assert out.shape == (n_nodes, n_classes)
    max_err = float(jnp.max(jnp.abs(out - ref)))
    assert jnp.allclose(out, ref, atol=2e-2, rtol=2e-2), max_err

    print("KERNEL_OK")
</pallas_src>

<mosaic_0001>
module attributes {stable_mosaic.version = 11 : i64} {
  func.func @_fused_gcn_kernel(%arg0: i32, %arg1: i32, %arg2: memref<128x128xbf16, #tpu.memory_space<vmem>>, %arg3: memref<128x128xbf16, #tpu.memory_space<any>>, %arg4: memref<1x128x128xbf16, #tpu.memory_space<vmem>>, %arg5: memref<1x1x128xf32, #tpu.memory_space<vmem>>, %arg6: memref<128x128xf32, #tpu.memory_space<vmem>>, %arg7: memref<2x128x128xbf16, #tpu.memory_space<vmem>>) attributes {dimension_semantics = [#tpu.dimension_semantics<arbitrary>, #tpu.dimension_semantics<arbitrary>], iteration_bounds = array<i64: 3, 1>, scalar_prefetch = 0 : i64, scratch_operands = 1 : i64, tpu.core_type = #tpu.core_type<tc>, window_params = [{transform_indices = @transform_0, window_bounds = array<i64: 128, 128>}, {}, {transform_indices = @transform_2, window_bounds = array<i64: 1, 128, 128>}, {transform_indices = @transform_3, window_bounds = array<i64: 1, 1, 128>}, {transform_indices = @transform_4, window_bounds = array<i64: 128, 128>}]} {
    %c2_i32 = arith.constant 2 : i32
    %c0_i32 = arith.constant 0 : i32
    %0 = arith.cmpi eq, %c2_i32, %c0_i32 : i32
    %c1_i32 = arith.constant 1 : i32
    %1 = arith.select %0, %c1_i32, %c2_i32 : i32
    %2 = arith.remsi %arg0, %1 : i32
    %c0_i32_0 = arith.constant 0 : i32
    %3 = arith.cmpi ne, %2, %c0_i32_0 : i32
    %c0_i32_1 = arith.constant 0 : i32
    %4 = arith.cmpi slt, %2, %c0_i32_1 : i32
    %c0_i32_2 = arith.constant 0 : i32
    %5 = arith.cmpi slt, %1, %c0_i32_2 : i32
    %6 = arith.xori %4, %5 : i1
    %7 = arith.andi %6, %3 : i1
    %8 = arith.addi %2, %1 : i32
    %9 = arith.select %7, %8, %2 : i32
    %c0_i32_3 = arith.constant 0 : i32
    %10 = arith.cmpi eq, %arg0, %c0_i32_3 : i32
    %c0_i32_4 = arith.constant 0 : i32
    %11 = arith.cmpi eq, %arg1, %c0_i32_4 : i32
    %12 = arith.andi %10, %11 : i1
    %13 = arith.extui %12 : i1 to i32
    %c0_i32_5 = arith.constant 0 : i32
    %14 = arith.cmpi ne, %13, %c0_i32_5 : i32
    scf.if %14 {
      %c0_i32_16 = arith.constant 0 : i32
      "tpu.region"() ({
        %32 = tpu.sem_alloc : memref<!tpu.dma_semaphore, #tpu.memory_space<semaphore_mem>>
        %c0_i32_17 = arith.constant 0 : i32
        %c0_i32_18 = arith.constant 0 : i32
        %33 = tpu.memref_slice %arg7[%c0_i32_16, %c0_i32_17, %c0_i32_18] : memref<2x128x128xbf16, #tpu.memory_space<vmem>> -> memref<1x128x128xbf16, #tpu.memory_space<vmem>>
        %34 = tpu.memref_squeeze %33 : memref<1x128x128xbf16, #tpu.memory_space<vmem>> -> memref<128x128xbf16, #tpu.memory_space<vmem>>
        tpu.enqueue_dma source(%arg3 : memref<128x128xbf16, #tpu.memory_space<any>>) target(%34 : memref<128x128xbf16, #tpu.memory_space<vmem>>) target_semaphore(%32 : memref<!tpu.dma_semaphore, #tpu.memory_space<semaphore_mem>>)
        %c0_i32_19 = arith.constant 0 : i32
        %c0_i32_20 = arith.constant 0 : i32
        %35 = tpu.memref_slice %arg7[%c0_i32_16, %c0_i32_19, %c0_i32_20] : memref<2x128x128xbf16, #tpu.memory_space<vmem>> -> memref<1x128x128xbf16, #tpu.memory_space<vmem>>
        %36 = tpu.memref_squeeze %35 : memref<1x128x128xbf16, #tpu.memory_space<vmem>> -> memref<128x128xbf16, #tpu.memory_space<vmem>>
        tpu.wait_dma2 semaphore(%32 : memref<!tpu.dma_semaphore, #tpu.memory_space<semaphore_mem>>) src(%arg3 : memref<128x128xbf16, #tpu.memory_space<any>>) dst(%36 : memref<128x128xbf16, #tpu.memory_space<vmem>>)
        tpu.yield
      }) : () -> ()
    } else {
    }
    %c0 = arith.constant 0 : index
    %c0_6 = arith.constant 0 : index
    %15 = vector.load %arg2[%c0, %c0_6] : memref<128x128xbf16, #tpu.memory_space<vmem>>, vector<128x128xbf16>
    %16 = arith.index_cast %9 : i32 to index
    %c0_7 = arith.constant 0 : index
    %c0_8 = arith.constant 0 : index
    %17 = vector.load %arg7[%16, %c0_7, %c0_8] : memref<2x128x128xbf16, #tpu.memory_space<vmem>>, vector<1x128x128xbf16>
    %18 = vector.shape_cast %17 : vector<1x128x128xbf16> to vector<128x128xbf16>
    %cst = arith.constant dense<0.000000e+00> : vector<128x128xf32>
    %19 = tpu.matmul %15, %18, %cst {dimension_numbers = #tpu.dot_dimension_numbers<[1], [0], [0], [1], [0, 0, 1, 1], [], []>} : vector<128x128xbf16>, vector<128x128xbf16>, vector<128x128xf32> -> vector<128x128xf32>
    %c0_9 = arith.constant 0 : index
    %c0_10 = arith.constant 0 : index
    %c0_11 = arith.constant 0 : index
    %20 = vector.load %arg5[%c0_9, %c0_10, %c0_11] : memref<1x1x128xf32, #tpu.memory_space<vmem>>, vector<1x1x128xf32>
    %21 = vector.shape_cast %20 : vector<1x1x128xf32> to vector<1x128xf32>
    %22 = vector.broadcast %21 : vector<1x128xf32> to vector<128x128xf32>
    %23 = arith.addf %19, %22 : vector<128x128xf32>
    %c128_i32 = arith.constant 128 : i32
    %24 = arith.muli %arg1, %c128_i32 : i32
    %25 = tpu.assume_multiple %24, 128 : i32
    %c2_i32_12 = arith.constant 2 : i32
    %26 = arith.cmpi ne, %arg0, %c2_i32_12 : i32
    %27 = arith.extui %26 : i1 to i32
    %c0_i32_13 = arith.constant 0 : i32
    %28 = arith.cmpi ne, %27, %c0_i32_13 : i32
    scf.if %28 {
      %cst_16 = arith.constant 0.000000e+00 : f32
      %32 = vector.broadcast %cst_16 : f32 to vector<128x128xf32>
      %33 = arith.maximumf %23, %32 : vector<128x128xf32>
      %34 = arith.truncf %33 : vector<128x128xf32> to vector<128x128xbf16>
      %c0_17 = arith.constant 0 : index
      %c0_18 = arith.constant 0 : index
      %c0_19 = arith.constant 0 : index
      %35 = vector.load %arg4[%c0_17, %c0_18, %c0_19] : memref<1x128x128xbf16, #tpu.memory_space<vmem>>, vector<1x128x128xbf16>
      %36 = vector.shape_cast %35 : vector<1x128x128xbf16> to vector<128x128xbf16>
      %cst_20 = arith.constant dense<0.000000e+00> : vector<128x128xf32>
      %37 = tpu.matmul %34, %36, %cst_20 {dimension_numbers = #tpu.dot_dimension_numbers<[1], [0], [0], [1], [0, 0, 1, 1], [], []>} : vector<128x128xbf16>, vector<128x128xbf16>, vector<128x128xf32> -> vector<128x128xf32>
      %38 = arith.truncf %37 : vector<128x128xf32> to vector<128x128xbf16>
      %c0_i32_21 = arith.constant 0 : i32
      %39 = arith.cmpi eq, %9, %c0_i32_21 : i32
      %40 = arith.extui %39 : i1 to i32
      %c0_i32_22 = arith.constant 0 : i32
      %41 = arith.cmpi ne, %40, %c0_i32_22 : i32
      scf.if %41 {
        %c1 = arith.constant 1 : index
        %45 = arith.index_cast %25 : i32 to index
        %c0_25 = arith.constant 0 : index
        %46 = vector.load %arg7[%c1, %45, %c0_25] : memref<2x128x128xbf16, #tpu.memory_space<vmem>>, vector<1x128x128xbf16>
        %47 = vector.shape_cast %46 : vector<1x128x128xbf16> to vector<128x128xbf16>
        %48 = vector.shape_cast %38 : vector<128x128xbf16> to vector<1x128x128xbf16>
        tpu.vector_store %arg7[%c1, %45, %c0_25], %48 {strides = array<i32>} : memref<2x128x128xbf16, #tpu.memory_space<vmem>>, vector<1x128x128xbf16>,
      } else {
      }
      %c1_i32_23 = arith.constant 1 : i32
      %42 = arith.cmpi eq, %9, %c1_i32_23 : i32
      %43 = arith.extui %42 : i1 to i32
      %c0_i32_24 = arith.constant 0 : i32
      %44 = arith.cmpi ne, %43, %c0_i32_24 : i32
      scf.if %44 {
        %c0_25 = arith.constant 0 : index
        %45 = arith.index_cast %25 : i32 to index
        %c0_26 = arith.constant 0 : index
        %46 = vector.load %arg7[%c0_25, %45, %c0_26] : memref<2x128x128xbf16, #tpu.memory_space<vmem>>, vector<1x128x128xbf16>
        %47 = vector.shape_cast %46 : vector<1x128x128xbf16> to vector<128x128xbf16>
        %48 = vector.shape_cast %38 : vector<128x128xbf16> to vector<1x128x128xbf16>
        tpu.vector_store %arg7[%c0_25, %45, %c0_26], %48 {strides = array<i32>} : memref<2x128x128xbf16, #tpu.memory_space<vmem>>, vector<1x128x128xbf16>,
      } else {
      }
    } else {
    }
    %c2_i32_14 = arith.constant 2 : i32
    %29 = arith.cmpi eq, %arg0, %c2_i32_14 : i32
    %30 = arith.extui %29 : i1 to i32
    %c0_i32_15 = arith.constant 0 : i32
    %31 = arith.cmpi ne, %30, %c0_i32_15 : i32
    scf.if %31 {
      %c0_16 = arith.constant 0 : index
      %c0_17 = arith.constant 0 : index
      %32 = vector.load %arg6[%c0_16, %c0_17] : memref<128x128xf32, #tpu.memory_space<vmem>>, vector<128x128xf32>
      tpu.vector_store %arg6[%c0_16, %c0_17], %23 {strides = array<i32>} : memref<128x128xf32, #tpu.memory_space<vmem>>, vector<128x128xf32>,
    } else {
    }
    return
  }
  func.func @transform_0(%arg0: i32, %arg1: i32) -> (i32, i32) {
    %c0_i32 = arith.constant 0 : i32
    %c0_i32_0 = arith.constant 0 : i32
    return %arg1, %c0_i32 : i32, i32
  }
  func.func @transform_2(%arg0: i32, %arg1: i32) -> (i32, i32, i32) {
    %c0_i32 = arith.constant 0 : i32
    %c0_i32_0 = arith.constant 0 : i32
    %c0_i32_1 = arith.constant 0 : i32
    return %arg0, %c0_i32, %c0_i32_0 : i32, i32, i32
  }
  func.func @transform_3(%arg0: i32, %arg1: i32) -> (i32, i32, i32) {
    %c0_i32 = arith.constant 0 : i32
    %c0_i32_0 = arith.constant 0 : i32
    %c0_i32_1 = arith.constant 0 : i32
    return %arg0, %c0_i32, %c0_i32_0 : i32, i32, i32
  }
  func.func @transform_4(%arg0: i32, %arg1: i32) -> (i32, i32) {
    %c0_i32 = arith.constant 0 : i32
    %c0_i32_0 = arith.constant 0 : i32
    return %arg1, %c0_i32 : i32, i32
  }
}

</mosaic_0001>

<bundles_post_ra>
// kernel: tpu_custom_call.1
= control target key start
LH: loop header
LB: loop body
LE: loop exit
PB: predicated region body
PF: predicated region fallthrough
CT: control target
= control target key end

     0   :  { %9 = vsyncpa [#allocation4], 0  ;;  %s1585_s0 = inlined_call_operand.hbm [shape: bf16[128,128], index: 0, kind: input, shape index: {}]   ;;  %s1586_s1 = inlined_call_operand.hbm [shape: bf16[128,128], index: 1, kind: input, shape index: {}]   ;;  %s1587_s2 = inlined_call_operand.hbm [shape: bf16[3,128,128], index: 2, kind: input, shape index: {}]   ;;  %s1588_s3 = inlined_call_operand.vmem [shape: f32[3,1,128], index: 3, kind: input, shape index: {}]   ;;  %s1589_s4 = inlined_call_operand.hbm [shape: f32[128,128], index: 4, kind: output, shape index: {}]  }
   0x1   :  { %10 = vsyncpa [#allocation7], 0 }
   0x2   :  { %12 = vsyncpa [#allocation7 + $0x1], 0 }
   0x3   :  { %13 = vsyncpa [#allocation5], 0  ;;  %s1276_s15 = smov 0   ;;  %s1278_s16 = smov 0  }
   0x4   :  { %s1280_s17 = smov 0   ;;  %s1282_s18 = smov 0  }
   0x5   :  { %s1284_s19 = smov 0   ;;  %s1286_s20 = smov 0  }
   0x6 LB: > { %s801_s21 = sadd.s32 4294967295, %s1241_s20   ;;  %p77_p0 = scmp.ne.s32.totalorder %s1225_s16, %s1221_s15  ;;  %s1241_s20 = sphi %s1286_s20, %s19_s20   ;;  %s1237_s19 = sphi %s1284_s19, %s1607_s19   ;;  %s1233_s18 = sphi %s1282_s18, %s1606_s18   ;;  %s1229_s17 = sphi %s1280_s17, %s1605_s17   ;;  %s1225_s16 = sphi %s1278_s16, %s1604_s16   ;;  %s1221_s15 = sphi %s1276_s15, %s1603_s15  }
   0x7   : > { %p1308_p1 = scmp.eq.s32.totalorder %s801_s21, 0  ;;  %p802_p2 = scmp.ge.s32.totalorder %s1241_s20, 1 }
   0x8   : > { %p140_p3 = scmp.lt.s32.totalorder %s1241_s20, 4  ;;  %s1243_s25 = smov [#allocation3]  }
   0x9   : > { %s1594_s22 = scalar_select %p1308_p1, 1, 0 }
   0xa   : > { %p1316_p4 = por %p1308_p1, %p77_p0  ;;  %p1320_p5 = pnand %p802_p2, %p140_p3 }
   0xb   : > { %s155_s26 = sshll.u32 %s1243_s25, 4  ;;  %s31_s28 = sadd.s32 1, %s1237_s19  ;;  %s156_s26 = int_to_ptr.vmem [resolvable:$true] %s155_s26 }
   0xc   : > { %s1595_s23 = scalar_select %p1316_p4, 1, 0 }
   0xd   : > { %s1596_s24 = scalar_select %p1320_p5, 1, 0 }
   0xe   : > { %p991_p6 = pneg %p1320_p5  ;;  %s1075_s5 = scalar_lea.hbm %s1585_s0, 1024 }
   0xf   : > { %p1076_p8 = scmp.ne.s32.totalorder %s1585_s0, %s1075_s5  ;;  %p1082_p12 = scmp.lt.u32.totalorder %s1075_s5, %s1585_s0 }
  0x10   : > { %p1328_p7 = pnand %p991_p6, %p1308_p1 }
  0x12   : > { %p1077_p9 = pneg %p1328_p7 }
  0x14   : > { %p1078_p10 = pnand %p1077_p9, %p1076_p8 }
  0x16   : > { %p1079_p11 = pneg %p1078_p10 }
  0x18   : > { %p1084_p13 = pnand %p1082_p12, %p1079_p11 }
  0x1a   : > { %1087 = shalt.err (!%p1084_p13)
}
  0x1b   : > { %s1088_s10 = scalar_lea.vmem %s156_s26, 1024  ;;  %p1096_p6 = scmp.lt.s32.totalorder %s156_s26, %s156_s26 }
  0x1c   : > { %p1089_p0 = scmp.ne.s32.totalorder %s156_s26, %s1088_s10  ;;  %p1097_p4 = scmp.lt.s32.totalorder %s1088_s10, %s1088_s10 }
  0x1e   : > { %p1091_p2 = pnand %p1089_p0, %p1077_p9  ;;  %p1098_p1 = por %p1097_p4, %p1096_p6 }
  0x20   : > { %p1092_p3 = pneg %p1091_p2 }
  0x22   : > { %p1099_p5 = pnand %p1098_p1, %p1092_p3 }
  0x24   : > { %1102 = shalt.err (!%p1099_p5)
}
  0x25   : > { %s1244_s11 = smov 64   ;;  %s1245_s12 = smov 4  }
  0x26   : > { %994 = dma.hbm_to_vmem [thread:$0]  (!%p1328_p7), %s1585_s0, 1024, %s156_s26, [#allocation4], %s1244_s11, %s1244_s11, %s1245_s12  }
  0x27   : > { %p33_p1 = scmp.ge.s32.totalorder %s31_s28, 3  ;;  %s64_s15 = sadd.s32 1, %s1229_s17 }
  0x28   : > { %p71_p4 = scmp.ne.s32.totalorder %s1229_s17, %s1225_s16  ;;  %p72_p5 = scmp.eq.s32.totalorder %s1241_s20, 0 }
  0x29   : > { %s1609_s28 = smov (%p33_p1, %s31_s28), 0  ;;  %p1000_p9 = scmp.lt.s32.totalorder %s1241_s20, 3 }
  0x2a   : > { %p73_p8 = por %p72_p5, %p71_p4  ;;  %s61_s25 = ssub.s32 %s1237_s19, %s1609_s28 }
  0x2b   : > { %s169_s29 = sand.u32 1, %s1229_s17   ;;  %p62_p10 = scmp.eq.s32.totalorder %s61_s25, 0 }
  0x2c   : > { %s805_s27 = sshll.u32 %s169_s29, 6  ;;  %s850_s30 = sshll.u32 %s1237_s19, 10 }
  0x2d   : > { %s1364_s5 = scalar_select %p62_p10, %s1229_s17, %s64_s15  }
  0x2e   : > { %s1369_s26 = scalar_lea.hbm %s1587_s2, %s850_s30  ;;  %s173_s8 = scalar_lea.vmem [#allocation6], %s805_s27 }
  0x2f   : > { %s180_s9 = sshll.u32 %s173_s8, 4  ;;  %p1371_p7 = pnand %p1000_p9, %p73_p8  ;;  %s1375_s9 = int_to_ptr.vmem [resolvable:$true] %s180_s9 }
  0x30   : > { %s1377_s13 = scalar_lea.sflag [#allocation7], %s169_s29  ;;  %s1103_s14 = scalar_lea.hbm %s1369_s26, 1024 }
  0x31   : > { %p1104_p11 = scmp.ne.s32.totalorder %s1369_s26, %s1103_s14  ;;  %p1105_p12 = pneg %p1371_p7 }
  0x32   : > { %s1108_s27 = scalar_lea.hbm %s1587_s2, 3072  ;;  %p1109_p2 = scmp.lt.u32.totalorder %s1369_s26, %s1587_s2 }
  0x33   : > { %p1106_p13 = pnand %p1105_p12, %p1104_p11  ;;  %p1110_p3 = scmp.lt.u32.totalorder %s1108_s27, %s1103_s14 }
  0x34   : > { %p1112_p1 = scmp.lt.u32.totalorder %s1103_s14, %s1369_s26 }
  0x35   : > { %p1107_p0 = pneg %p1106_p13  ;;  %p1111_p6 = por %p1110_p3, %p1109_p2 }
  0x37   : > { %p1113_p4 = por %p1112_p1, %p1111_p6 }
  0x39   : > { %p1114_p5 = pnand %p1113_p4, %p1107_p0 }
  0x3b   : > { %1117 = shalt.err (!%p1114_p5)
}
  0x3c   : > { %s1118_s29 = scalar_lea.vmem %s1375_s9, 1024  ;;  %s1246_s7 = smov [#allocation6]  }
  0x3d   : > { %p1119_p8 = scmp.ne.s32.totalorder %s1375_s9, %s1118_s29  ;;  %s1123_s8 = sshll.u32 %s1246_s7, 4  ;;  %s1124_s8 = int_to_ptr.vmem [resolvable:$false] %s1123_s8 }
  0x3e   : > { %s1125_s15 = scalar_lea.vmem %s1124_s8, 2048  ;;  %p1126_p11 = scmp.lt.s32.totalorder %s1375_s9, %s1124_s8 }
  0x3f   : > { %p1121_p9 = pnand %p1119_p8, %p1105_p12  ;;  %p1127_p13 = scmp.lt.s32.totalorder %s1125_s15, %s1118_s29 }
  0x41   : > { %p1122_p10 = pneg %p1121_p9  ;;  %p1128_p2 = por %p1127_p13, %p1126_p11 }
  0x43   : > { %p1129_p3 = pnand %p1128_p2, %p1122_p10 }
  0x45   : > { %1132 = shalt.err (!%p1129_p3)
}
  0x46   : > { %998 = dma.hbm_to_vmem [thread:$0]  (!%p1371_p7), %s1369_s26, 1024, %s1375_s9, %s1377_s13, %s1244_s11, %s1244_s11, %s1245_s12  }
  0x47   : > { %p1599_p12 = scmp.ne.s32.totalorder %s1596_s24, 0 }
  0x48   : > { %p1600_p0 = scmp.ne.s32.totalorder (!%p1599_p12), %s1594_s22, 0 }
  0x49   : > { %198 = sbr.rel (%p1599_p12) target bundleno = 641 (0x281), region = 32 }
  0x50   : > { %1206 = dma.done.wait (%p1600_p0), [#allocation4], 1024  }
  0x51   : > { %1208 = vsyncadd (%p1600_p0), [#allocation4], 4294966272  ;;  %s204_s14 = sand.u32 1, %s1225_s16   ;;  %p1601_p6 = scmp.ne.s32.totalorder %s1595_s23, 0 }
  0x52   : > { %s810_s10 = sshll.u32 %s204_s14, 6  ;;  %s205_s25 = scalar_lea.sflag [#allocation7], %s204_s14 }
  0x53   : > { %s1415_s27 = scalar_lea.vmem [#allocation6], %s810_s10 }
  0x54   : > { %1210 = dma.done.wait (%p1601_p6), %s205_s25, 1024  }
  0x55   : > { %1212 = vsyncadd (%p1601_p6), %s205_s25, 4294966272  ;;  %p230_p7 = scmp.lt.s32.totalorder %s1233_s18, 2  ;;  %p235_p1 = scmp.lt.s32.totalorder %s1233_s18, 0 }
  0x56   : > { %s236_s22 = ssub.s32 0, %s1233_s18  ;;  %p247_p4 = scmp.eq.s32.totalorder %s1233_s18, 0 }
  0x57   : > { %s1426_s24 = scalar_select %p230_p7, %s1233_s18, 2 }
  0x58   : > { %s811_s11 = smin.u32 %s1233_s18, %s236_s22  ;;  %252 = sbr.rel (!%p247_p4) target bundleno = 114 (0x72), region = 44 }
  0x59   : > { %s232_s9 = scalar_lea.vmem %s1588_s3, %s1426_s24  ;;  %s238_s23 = sand.u32 1, %s811_s11  }
  0x5a   : > { %s239_s13 = ssub.s32 0, %s238_s23 }
  0x5b   : > { %s1611_s13 = smov (!%p235_p1, %s239_s13), %s238_s23 }
  0x5c   : > { %p813_p5 = scmp.lt.s32.totalorder %s1611_s13, 0  ;;  %s245_s30 = sadd.s32 2, %s1611_s13 }
  0x5e   : > { %s1613_s30 = smov (!%p813_p5, %s245_s30), %s1611_s13 }
  0x5f   : > { %s1247_s6 = smov [#allocation2]   ;;  %s1133_s15 = scalar_lea.hbm %s1586_s1, 1024 }
  0x60   : > { %s260_s29 = sshll.u32 %s1247_s6, 4  ;;  %p1134_p8 = scmp.ne.s32.totalorder %s1586_s1, %s1133_s15  ;;  %s261_s29 = int_to_ptr.vmem [resolvable:$true] %s260_s29 }
  0x61   : > { %p1137_p9 = scmp.lt.u32.totalorder %s1133_s15, %s1586_s1 }
  0x63   : > { %p1139_p10 = pnand %p1137_p9, %p1134_p8 }
  0x65   : > { %1142 = shalt.err (!%p1139_p10)  }
  0x66   : > { %s1143_s11 = scalar_lea.vmem %s261_s29, 1024  ;;  %s1147_s12 = scalar_lea.vmem %s261_s29, 2048 }
  0x67   : > { %p1144_p11 = scmp.ne.s32.totalorder %s261_s29, %s1143_s11  ;;  %p1148_p13 = scmp.lt.s32.totalorder %s261_s29, %s261_s29 }
  0x68   : > { %p1149_p2 = scmp.lt.s32.totalorder %s1147_s12, %s1143_s11 }
  0x6a   : > { %p1150_p3 = por %p1149_p2, %p1148_p13 }
  0x6c   : > { %p1151_p12 = pnand %p1150_p3, %p1144_p11 }
  0x6e   : > { %1154 = shalt.err (!%p1151_p12)  }
  0x6f   : > { %263 = dma.hbm_to_vmem [thread:$0]  %s1586_s1, 1024, %s261_s29, [#allocation9] }
  0x70   : > { %1213 = dma.done.wait [#allocation9], 1024 }
  0x71   : > { %1214 = vsyncadd [#allocation9], 4294966272 }
  0x72 PF: > { %s852_s13 = sshll.u32 %s1613_s30, 6  ;;  %v1059_v0 = vld [vmem:[#allocation3] sm:$0xff]   ;;  %v1061_v10 = vld [vmem:[#allocation3 + $0x8] sm:$0xff]   ;;  %v1063_v12 = vld [vmem:[#allocation3 + $0x10] sm:$0xff]   ;;  %p826_p0 = scmp.eq.s32.totalorder %s1233_s18, 2 }
  0x73   : > { %s1448_s6 = scalar_lea.vmem [#allocation2], %s852_s13  ;;  %901 = vmatprep.mubr.bf16.mxu0 %v1059_v0  ;;  %v1060_v3 = vld [vmem:[#allocation3 + $0x20] sm:$0xff]   ;;  %v1062_v11 = vld [vmem:[#allocation3 + $0x28] sm:$0xff]   ;;  %v1064_v13 = vld [vmem:[#allocation3 + $0x30] sm:$0xff]   ;;  %p835_p6 = scmp.ne.s32.totalorder (!%p826_p0), %s1613_s30, 0 }
  0x74   : > { %v287_v1 = vld [vmem:[%s1448_s6] sm:$0xff]  ;;  %v288_v2 = vld [vmem:[%s1448_s6 + $0x8] sm:$0xff]  ;;  %v289_v4 = vld [vmem:[%s1448_s6 + $0x10] sm:$0xff]  ;;  %909 = vmatprep.mubr.bf16.mxu1 %v1060_v3 }
  0x75   : > { %885 = vmatprep.subr.bf16.mxu0 %v287_v1  ;;  %949 = vmatprep.subr.bf16.mxu1 %v287_v1  ;;  %v290_v5 = vld [vmem:[%s1448_s6 + $0x18] sm:$0xff]  ;;  %v291_v6 = vld [vmem:[%s1448_s6 + $0x20] sm:$0xff]  ;;  %v292_v7 = vld [vmem:[%s1448_s6 + $0x28] sm:$0xff] }
  0x76   : > { %886 = vmatpush3.bf16.msra.mxu0 %v287_v1  ;;  %957 = vmatpush3.bf16.msra.mxu1 %v287_v1  ;;  %v293_v8 = vld [vmem:[%s1448_s6 + $0x30] sm:$0xff]  ;;  %v294_v9 = vld [vmem:[%s1448_s6 + $0x38] sm:$0xff]  ;;  %v817_v16 = vld [vmem:[%s232_s9] ss:$0 sm:$0xff] }
  0x77   : > { %887 = vmatprep.subr.bf16.mxu0 %v288_v2  ;;  %950 = vmatprep.subr.bf16.mxu1 %v288_v2  ;;  %v1065_v14 = vld [vmem:[#allocation3 + $0x18] sm:$0xff]   ;;  %v1067_v49 = vld [vmem:[%s1415_s27] sm:$0xff] (!%p826_p0)   ;;  %v1068_v51 = vld [vmem:[%s1415_s27 + $0x8] sm:$0xff] (!%p826_p0)  }
  0x78   : > { %v1066_v15 = vld [vmem:[#allocation3 + $0x38] sm:$0xff]   ;;  %v1069_v56 = vld [vmem:[%s1415_s27 + $0x10] sm:$0xff] (!%p826_p0)   ;;  %v1071_v59 = vld [vmem:[%s1415_s27 + $0x20] sm:$0xff] (!%p826_p0)  }
  0x79   : > { %v1070_v58 = vld [vmem:[%s1415_s27 + $0x18] sm:$0xff] (!%p826_p0)   ;;  %v1072_v60 = vld [vmem:[%s1415_s27 + $0x28] sm:$0xff] (!%p826_p0)   ;;  %v1073_v61 = vld [vmem:[%s1415_s27 + $0x30] sm:$0xff] (!%p826_p0)  }
  0x7a   : > { %888 = vmatpush3.bf16.msra.mxu0 %v288_v2  ;;  %958 = vmatpush3.bf16.msra.mxu1 %v288_v2  ;;  %v1074_v62 = vld [vmem:[%s1415_s27 + $0x38] sm:$0xff] (!%p826_p0)  }
  0x7b   : > { %889 = vmatprep.subr.bf16.mxu0 %v289_v4  ;;  %951 = vmatprep.subr.bf16.mxu1 %v289_v4 }
  0x7e   : > { %890 = vmatpush3.bf16.msra.mxu0 %v289_v4  ;;  %959 = vmatpush3.bf16.msra.mxu1 %v289_v4 }
  0x7f   : > { %891 = vmatprep.subr.bf16.mxu0 %v290_v5  ;;  %952 = vmatprep.subr.bf16.mxu1 %v290_v5 }
  0x82   : > { %892 = vmatpush3.bf16.msra.mxu0 %v290_v5  ;;  %960 = vmatpush3.bf16.msra.mxu1 %v290_v5 }
  0x83   : > { %893 = vmatprep.subr.bf16.mxu0 %v291_v6  ;;  %953 = vmatprep.subr.bf16.mxu1 %v291_v6 }
  0x86   : > { %894 = vmatpush3.bf16.msra.mxu0 %v291_v6  ;;  %961 = vmatpush3.bf16.msra.mxu1 %v291_v6 }
  0x87   : > { %895 = vmatprep.subr.bf16.mxu0 %v292_v7  ;;  %954 = vmatprep.subr.bf16.mxu1 %v292_v7 }
  0x8a   : > { %896 = vmatpush3.bf16.msra.mxu0 %v292_v7  ;;  %962 = vmatpush3.bf16.msra.mxu1 %v292_v7 }
  0x8b   : > { %897 = vmatprep.subr.bf16.mxu0 %v293_v8  ;;  %955 = vmatprep.subr.bf16.mxu1 %v293_v8 }
  0x8e   : > { %898 = vmatpush3.bf16.msra.mxu0 %v293_v8  ;;  %963 = vmatpush3.bf16.msra.mxu1 %v293_v8 }
  0x8f   : > { %899 = vmatprep.subr.bf16.mxu0 %v294_v9  ;;  %956 = vmatprep.subr.bf16.mxu1 %v294_v9 }
  0x92   : > { %900 = vmatpush3.bf16.msra.mxu0 %v294_v9  ;;  %964 = vmatpush3.bf16.msra.mxu1 %v294_v9 }
  0x93   : > { %917 = vmatprep.subr.bf16.mxu0 (!%p826_p0), %v1067_v49  ;;  %965 = vmatprep.subr.bf16.mxu1 (!%p826_p0), %v1067_v49 }
  0x95   : > { %902 = vmatmul.mubr.bf16.vlgmr.msra.gmra.mrb[0].mxu0 %v1061_v10  ;;  %910 = vmatmul.mubr.bf16.vlgmr.msra.gmra.mrb[0].mxu1 %v1062_v11 }
  0x96   : > { %905 = vmatprep.mubr.bf16.mxu0 %v1063_v12  ;;  %913 = vmatprep.mubr.bf16.mxu1 %v1064_v13 }
  0x97   : > { %918 = vmatpush3.bf16.msra.mxu0 (!%p826_p0), %v1067_v49  ;;  %973 = vmatpush3.bf16.msra.mxu1 (!%p826_p0), %v1067_v49 }
  0x98   : > { %919 = vmatprep.subr.bf16.mxu0 (!%p826_p0), %v1068_v51  ;;  %966 = vmatprep.subr.bf16.mxu1 (!%p826_p0), %v1068_v51 }
  0x9b   : > { %920 = vmatpush3.bf16.msra.mxu0 (!%p826_p0), %v1068_v51  ;;  %974 = vmatpush3.bf16.msra.mxu1 (!%p826_p0), %v1068_v51 }
  0x9c   : > { %921 = vmatprep.subr.bf16.mxu0 (!%p826_p0), %v1069_v56  ;;  %967 = vmatprep.subr.bf16.mxu1 (!%p826_p0), %v1069_v56 }
  0x9d   : > { %906 = vmatmul.mubr.bf16.gmra.mrb[4].mxu0 %v1065_v14  ;;  %914 = vmatmul.mubr.bf16.gmra.mrb[4].mxu1 %v1066_v15 }
  0x9f   : > { %922 = vmatpush3.bf16.msra.mxu0 (!%p826_p0), %v1069_v56  ;;  %975 = vmatpush3.bf16.msra.mxu1 (!%p826_p0), %v1069_v56 }
  0xa0   : > { %923 = vmatprep.subr.bf16.mxu0 (!%p826_p0), %v1070_v58  ;;  %968 = vmatprep.subr.bf16.mxu1 (!%p826_p0), %v1070_v58 }
  0xa3   : > { %924 = vmatpush3.bf16.msra.mxu0 (!%p826_p0), %v1070_v58  ;;  %976 = vmatpush3.bf16.msra.mxu1 (!%p826_p0), %v1070_v58 }
  0xa4   : > { %925 = vmatprep.subr.bf16.mxu0 (!%p826_p0), %v1071_v59  ;;  %969 = vmatprep.subr.bf16.mxu1 (!%p826_p0), %v1071_v59 }
  0xa7   : > { %926 = vmatpush3.bf16.msra.mxu0 (!%p826_p0), %v1071_v59  ;;  %977 = vmatpush3.bf16.msra.mxu1 (!%p826_p0), %v1071_v59 }
  0xa8   : > { %927 = vmatprep.subr.bf16.mxu0 (!%p826_p0), %v1072_v60  ;;  %970 = vmatprep.subr.bf16.mxu1 (!%p826_p0), %v1072_v60 }
  0xab   : > { %928 = vmatpush3.bf16.msra.mxu0 (!%p826_p0), %v1072_v60  ;;  %978 = vmatpush3.bf16.msra.mxu1 (!%p826_p0), %v1072_v60 }
  0xac   : > { %929 = vmatprep.subr.bf16.mxu0 (!%p826_p0), %v1073_v61  ;;  %971 = vmatprep.subr.bf16.mxu1 (!%p826_p0), %v1073_v61 }
  0xaf   : > { %930 = vmatpush3.bf16.msra.mxu0 (!%p826_p0), %v1073_v61  ;;  %979 = vmatpush3.bf16.msra.mxu1 (!%p826_p0), %v1073_v61 }
  0xb0   : > { %931 = vmatprep.subr.bf16.mxu0 (!%p826_p0), %v1074_v62  ;;  %972 = vmatprep.subr.bf16.mxu1 (!%p826_p0), %v1074_v62 }
  0xb3   : > { %932 = vmatpush3.bf16.msra.mxu0 (!%p826_p0), %v1074_v62  ;;  %980 = vmatpush3.bf16.msra.mxu1 (!%p826_p0), %v1074_v62 }
 0x168   : > { %v903_v17 = vpop.f32.mrb[0].mxu0  ;;  %v911_v18 = vpop.f32.mrb[0].mxu1 }
 0x169   : > { %v1463_v19 = vadd.f32 %v903_v17, %v817_v16  ;;  %v1465_v20 = vadd.f32 %v911_v18, %v817_v16  ;;  %v384_v21 = vpop.f32.mrb[1].mxu0  ;;  %v416_v22 = vpop.f32.mrb[1].mxu1 }
 0x16a   : > { %v1467_v23 = vadd.f32 %v817_v16, %v384_v21  ;;  %v1469_v24 = vadd.f32 %v817_v16, %v416_v22  ;;  %v904_v25 = vpop.f32.mrb[2].mxu0  ;;  %v912_v26 = vpop.f32.mrb[2].mxu1 }
 0x16b   : > { %v1471_v27 = vadd.f32 %v904_v25, %v817_v16  ;;  %v1473_v28 = vadd.f32 %v912_v26, %v817_v16  ;;  %v387_v29 = vpop.f32.mrb[3].mxu0  ;;  %v419_v30 = vpop.f32.mrb[3].mxu1  ;;  %v454_v63 = vmax.f32 (!%p826_p0), %v1463_v19, 0.0  ;;  %v462_v1 = vmax.f32 (!%p826_p0), %v1465_v20, 0.0 }
 0x16c   : > { %v1475_v31 = vadd.f32 %v817_v16, %v387_v29  ;;  %v1477_v32 = vadd.f32 %v817_v16, %v419_v30  ;;  %v452_v50 = vmax.f32 (!%p826_p0), %v1467_v23, 0.0  ;;  %v460_v53 = vmax.f32 (!%p826_p0), %v1469_v24, 0.0 }
 0x16d   : > { %v455_v0 = vmax.f32 (!%p826_p0), %v1471_v27, 0.0  ;;  %v463_v2 = vmax.f32 (!%p826_p0), %v1473_v28, 0.0 }
 0x16e   : > { %451 = sbr.rel (%p826_p0) target bundleno = 606 (0x25e), region = 53  ;;  %v453_v52 = vmax.f32 (!%p826_p0), %v1475_v31, 0.0  ;;  %v461_v55 = vmax.f32 (!%p826_p0), %v1477_v32, 0.0 }
 0x16f   : > { %v469_v7 = vpack.c.bf16 (!%p826_p0), %v455_v0, %v454_v63  ;;  %v473_v8 = vpack.c.bf16 (!%p826_p0), %v463_v2, %v462_v1 }
 0x170   : > { %v907_v33 = vpop.f32.mrb[4].mxu0  ;;  %v915_v34 = vpop.f32.mrb[4].mxu1  ;;  %v468_v54 = vpack.c.bf16 (!%p826_p0), %v453_v52, %v452_v50  ;;  %v472_v57 = vpack.c.bf16 (!%p826_p0), %v461_v55, %v460_v53 }
 0x171   : > { %v1479_v35 = vadd.f32 %v907_v33, %v817_v16  ;;  %v1481_v36 = vadd.f32 %v915_v34, %v817_v16  ;;  %v400_v37 = vpop.f32.mrb[5].mxu0  ;;  %v432_v38 = vpop.f32.mrb[5].mxu1 }
 0x172   : > { %v1483_v39 = vadd.f32 %v817_v16, %v400_v37  ;;  %v1485_v40 = vadd.f32 %v817_v16, %v432_v38  ;;  %v908_v41 = vpop.f32.mrb[6].mxu0  ;;  %v916_v42 = vpop.f32.mrb[6].mxu1  ;;  %933 = vmatprep.mubr.bf16.mxu0 (!%p826_p0), %v468_v54  ;;  %941 = vmatprep.mubr.bf16.mxu1 (!%p826_p0), %v472_v57 }
 0x173   : > { %v1487_v43 = vadd.f32 %v908_v41, %v817_v16  ;;  %v1489_v44 = vadd.f32 %v916_v42, %v817_v16  ;;  %v403_v45 = vpop.f32.mrb[7].mxu0  ;;  %v435_v46 = vpop.f32.mrb[7].mxu1  ;;  %934 = vmatmul.mubr.bf16.vlgmr.msra.gmra.mrb[0].mxu0 (!%p826_p0), %v469_v7  ;;  %942 = vmatmul.mubr.bf16.vlgmr.msra.gmra.mrb[0].mxu1 (!%p826_p0), %v473_v8  ;;  %v458_v11 = vmax.f32 (!%p826_p0), %v1479_v35, 0.0  ;;  %v466_v13 = vmax.f32 (!%p826_p0), %v1481_v36, 0.0 }
 0x174   : > { %v1491_v47 = vadd.f32 %v817_v16, %v403_v45  ;;  %v1493_v48 = vadd.f32 %v817_v16, %v435_v46  ;;  %v456_v3 = vmax.f32 (!%p826_p0), %v1483_v39, 0.0  ;;  %v464_v5 = vmax.f32 (!%p826_p0), %v1485_v40, 0.0 }
 0x175   : > { %v459_v12 = vmax.f32 %v1487_v43, 0.0  ;;  %v467_v14 = vmax.f32 %v1489_v44, 0.0 }
 0x176   : > { %v457_v4 = vmax.f32 %v1491_v47, 0.0  ;;  %v465_v6 = vmax.f32 %v1493_v48, 0.0 }
 0x177   : > { %v471_v15 = vpack.c.bf16 %v459_v12, %v458_v11  ;;  %v475_v16 = vpack.c.bf16 %v467_v14, %v466_v13 }
 0x178   : > { %v470_v9 = vpack.c.bf16 %v457_v4, %v456_v3  ;;  %v474_v10 = vpack.c.bf16 %v465_v6, %v464_v5 }
 0x17a   : > { %937 = vmatprep.mubr.bf16.mxu0 %v470_v9  ;;  %945 = vmatprep.mubr.bf16.mxu1 %v474_v10 }
 0x17b   : > { %938 = vmatmul.mubr.bf16.gmra.mrb[4].mxu0 %v471_v15  ;;  %946 = vmatmul.mubr.bf16.gmra.mrb[4].mxu1 %v475_v16 }
 0x246   : > { %v935_v17 = vpop.f32.mrb[0].mxu0  ;;  %v943_v18 = vpop.f32.mrb[0].mxu1 }
 0x247   : > { %v574_v21 = vpop.f32.mrb[1].mxu0  ;;  %v606_v22 = vpop.f32.mrb[1].mxu1 }
 0x248   : > { %v936_v25 = vpop.f32.mrb[2].mxu0  ;;  %v944_v26 = vpop.f32.mrb[2].mxu1 }
 0x249   : > { %v638_v29 = vpack.c.bf16 %v936_v25, %v935_v17  ;;  %v642_v30 = vpack.c.bf16 %v944_v26, %v943_v18  ;;  %v577_v33 = vpop.f32.mrb[3].mxu0  ;;  %v609_v34 = vpop.f32.mrb[3].mxu1 }
 0x24a   : > { %v637_v37 = vpack.c.bf16 %v577_v33, %v574_v21  ;;  %v641_v38 = vpack.c.bf16 %v609_v34, %v606_v22 }
 0x24b   : > { %837 = vst [vmem:[#allocation2 + $0x48] sm:$0xff] (!%p835_p6), %v638_v29  ;;  %841 = vst [vmem:[#allocation2 + $0x68] sm:$0xff] (!%p835_p6), %v642_v30 }
 0x24c   : > { %648 = sbr.rel (%p835_p6) target bundleno = 597 (0x255), region = 57  ;;  %836 = vst [vmem:[#allocation2 + $0x40] sm:$0xff] (!%p835_p6), %v637_v37  ;;  %840 = vst [vmem:[#allocation2 + $0x60] sm:$0xff] (!%p835_p6), %v641_v38 }
 0x24e   : > { %v939_v41 = vpop.f32.mrb[4].mxu0  ;;  %v947_v42 = vpop.f32.mrb[4].mxu1 }
 0x24f   : > { %v590_v45 = vpop.f32.mrb[5].mxu0  ;;  %v622_v46 = vpop.f32.mrb[5].mxu1 }
 0x250   : > { %v940_v49 = vpop.f32.mrb[6].mxu0  ;;  %v948_v50 = vpop.f32.mrb[6].mxu1 }
 0x251   : > { %v640_v51 = vpack.c.bf16 %v940_v49, %v939_v41  ;;  %v644_v52 = vpack.c.bf16 %v948_v50, %v947_v42  ;;  %v593_v53 = vpop.f32.mrb[7].mxu0  ;;  %v625_v54 = vpop.f32.mrb[7].mxu1 }
 0x252   : > { %v639_v55 = vpack.c.bf16 %v593_v53, %v590_v45  ;;  %v643_v56 = vpack.c.bf16 %v625_v54, %v622_v46 }
 0x253   : > { %839 = vst [vmem:[#allocation2 + $0x58] sm:$0xff] %v640_v51  ;;  %843 = vst [vmem:[#allocation2 + $0x78] sm:$0xff] %v644_v52 }
 0x254   : > { %838 = vst [vmem:[#allocation2 + $0x50] sm:$0xff] %v639_v55  ;;  %842 = vst [vmem:[#allocation2 + $0x70] sm:$0xff] %v643_v56 }
 0x255 PF: > { %p844_p7 = scmp.ne.s32.totalorder %s1613_s30, 1 }
 0x256   : > { %670 = vst [vmem:[#allocation2] sm:$0xff] (!%p844_p7), %v637_v37  ;;  %671 = vst [vmem:[#allocation2 + $0x8] sm:$0xff] (!%p844_p7), %v638_v29 }
 0x257   : > { %665 = sbr.rel (%p844_p7) target bundleno = 606 (0x25e), region = 61  ;;  %672 = vst [vmem:[#allocation2 + $0x10] sm:$0xff] (!%p844_p7), %v639_v55  ;;  %673 = vst [vmem:[#allocation2 + $0x18] sm:$0xff] (!%p844_p7), %v640_v51 }
 0x258   : > { %674 = vst [vmem:[#allocation2 + $0x20] sm:$0xff] (!%p844_p7), %v641_v38  ;;  %675 = vst [vmem:[#allocation2 + $0x28] sm:$0xff] (!%p844_p7), %v642_v30 }
 0x259   : > { %676 = vst [vmem:[#allocation2 + $0x30] sm:$0xff] (!%p844_p7), %v643_v56  ;;  %677 = vst [vmem:[#allocation2 + $0x38] sm:$0xff] (!%p844_p7), %v644_v52 }
 0x25e PF: > { %p845_p1 = scmp.ne.s32.totalorder %s1233_s18, 2 }
 0x25f   : > { %682 = vst [vmem:[#allocation8] sm:$0xff] (!%p845_p1), %v1467_v23  ;;  %683 = vst [vmem:[#allocation8 + $0x8] sm:$0xff] (!%p845_p1), %v1475_v31 }
 0x260   : > { %681 = sbr.rel (%p845_p1) target bundleno = 615 (0x267), region = 65  ;;  %684 = vst [vmem:[#allocation8 + $0x10] sm:$0xff] (!%p845_p1), %v1463_v19  ;;  %685 = vst [vmem:[#allocation8 + $0x18] sm:$0xff] (!%p845_p1), %v1471_v27 }
 0x261   : > { %686 = vst [vmem:[#allocation8 + $0x20] sm:$0xff] (!%p845_p1), %v1483_v39  ;;  %687 = vst [vmem:[#allocation8 + $0x28] sm:$0xff] (!%p845_p1), %v1491_v47 }
 0x262   : > { %688 = vst [vmem:[#allocation8 + $0x30] sm:$0xff] (!%p845_p1), %v1479_v35  ;;  %689 = vst [vmem:[#allocation8 + $0x38] sm:$0xff] (!%p845_p1), %v1487_v43 }
 0x263   : > { %690 = vst [vmem:[#allocation8 + $0x40] sm:$0xff] (!%p845_p1), %v1469_v24  ;;  %691 = vst [vmem:[#allocation8 + $0x48] sm:$0xff] (!%p845_p1), %v1477_v32 }
 0x264   : > { %692 = vst [vmem:[#allocation8 + $0x50] sm:$0xff] (!%p845_p1), %v1465_v20  ;;  %693 = vst [vmem:[#allocation8 + $0x58] sm:$0xff] (!%p845_p1), %v1473_v28 }
 0x265   : > { %694 = vst [vmem:[#allocation8 + $0x60] sm:$0xff] (!%p845_p1), %v1485_v40  ;;  %695 = vst [vmem:[#allocation8 + $0x68] sm:$0xff] (!%p845_p1), %v1493_v48 }
 0x266   : > { %696 = vst [vmem:[#allocation8 + $0x70] sm:$0xff] (!%p845_p1), %v1481_v36  ;;  %697 = vst [vmem:[#allocation8 + $0x78] sm:$0xff] (!%p845_p1), %v1489_v44 }
 0x267 PF: > { %p1541_p4 = scmp.eq.s32.totalorder %s801_s21, 2  ;;  %s1248_s27 = smov [#allocation8]  }
 0x268   : > { %s707_s24 = sshll.u32 %s1248_s27, 4  ;;  %s708_s24 = int_to_ptr.vmem [resolvable:$true] %s707_s24 }
 0x269   : > { %s1155_s9 = scalar_lea.vmem %s708_s24, 2048  ;;  %p1162_p10 = scmp.lt.s32.totalorder %s708_s24, %s708_s24 }
 0x26a   : > { %p1156_p5 = scmp.ne.s32.totalorder %s708_s24, %s1155_s9  ;;  %p1163_p11 = scmp.lt.s32.totalorder %s1155_s9, %s1155_s9 }
 0x26c   : > { %p1157_p8 = pnand %p1156_p5, %p1541_p4  ;;  %p1164_p13 = por %p1163_p11, %p1162_p10 }
 0x26e   : > { %p1158_p9 = pneg %p1157_p8 }
 0x270   : > { %p1165_p2 = pnand %p1164_p13, %p1158_p9 }
 0x272   : > { %1168 = shalt.err (!%p1165_p2)
}
 0x273   : > { %s1169_s21 = scalar_lea.hbm %s1589_s4, 2048 }
 0x274   : > { %p1170_p3 = scmp.ne.s32.totalorder %s1589_s4, %s1169_s21  ;;  %p1175_p6 = scmp.lt.u32.totalorder %s1169_s21, %s1589_s4 }
 0x276   : > { %p1171_p12 = pnand %p1170_p3, %p1541_p4 }
 0x278   : > { %p1172_p0 = pneg %p1171_p12 }
 0x27a   : > { %p1177_p7 = pnand %p1175_p6, %p1172_p0 }
 0x27c   : > { %1180 = shalt.err (!%p1177_p7)
}
 0x27d   : > { %s1249_s22 = smov 128   ;;  %s1250_s11 = smov 8  }
 0x27e   : > { %988 = dma.vmem_to_hbm [thread:$0]  (%p1541_p4), %s708_s24, 2048, %s1589_s4, [#allocation5], %s1249_s22, %s1249_s22, %s1250_s11  }
 0x27f   : > { %1216 = dma.done.wait (%p1541_p4), [#allocation5], 2048  }
 0x280   : > { %1218 = vsyncadd (%p1541_p4), [#allocation5], 4294965248 }
 0x281 PF: > { %s19_s20 = sadd.s32 1, %s1241_s20   ;;  %s1603_s15 = smov %s1225_s16 }
 0x282   : > { %p16_p1 = scmp.ge.s32.totalorder %s19_s20, 5   ;;  %s1604_s16 = smov %s1229_s17 }
 0x283   : > { %s1605_s17 = smov %s1364_s5  ;;  %s1606_s18 = smov %s1237_s19 }
 0x284   : > { %s1607_s19 = smov %s1609_s28  ;;  %18 = sbr.rel (!%p16_p1) target bundleno = 6 (0x6), region = 107 }
 0x28b   :  { %723 = vsyncpa [#allocation4], 1 }
 0x28c   :  { %725 = vsyncpa [#allocation4 + $0x1], 1 }
 0x28d   :  { %726 = vsyncpa [#allocation7], 1 }
 0x28e   :  { %728 = vsyncpa [#allocation7 + $0x1], 1 }
 0x28f   :  { %729 = vsyncpa [#allocation5], 1 }
 0x290   :  { %731 = vsyncpa [#allocation5 + $0x1], 1 }

</bundles_post_ra>
